<compile_context>
chip_gen: v6e
topology: v6e:2x2x1
jax: 0.10.0
libtpu: 0.0.40
codegen_flags: <defaults>
</compile_context>

<pallas_src>
import jax
import jax.numpy as jnp
from jax.experimental import pallas as pl
from jax.experimental.pallas import tpu as pltpu


# --------------------------------------------------------------------------
# Helpers
# --------------------------------------------------------------------------
def _round_up(n, m):
    return pl.cdiv(n, m) * m


def _vmem_capacity_bytes():
    """Physical VMEM per TensorCore (128 MiB on v5e/v6e, 64 MiB on v7x)."""
    try:
        return int(pltpu.get_tpu_info().vmem_capacity_bytes)
    except Exception:
        return 64 << 20  # conservative (v7x-sized) fallback


def _pick_hw_tile(hw, c, budget_bytes, min_tiles=1):
    """Lane tile (multiple of 128) for the tiled path.

    Largest multiple-of-128 tile whose 2x(in+out) double-buffered f32 blocks
    fit the budget (big tiles amortize the ~0.35 us/grid-step overhead),
    optionally capped so at least `min_tiles` tiles exist (v7x megacore
    load-balancing when B == 1), floored at one 128-lane vreg.
    """
    hw_padded = _round_up(hw, 128)
    budget_lanes = max(((budget_bytes // (16 * c)) // 128) * 128, 128)
    min_tiles = max(int(min_tiles), 1)
    tile_cap = _round_up(pl.cdiv(hw, min_tiles), 128)
    return int(max(128, min(hw_padded, budget_lanes, tile_cap)))


# --------------------------------------------------------------------------
# Kernels
# --------------------------------------------------------------------------
def _scse_fused_kernel(x_ref, w1_ref, b1_ref, w2_ref, b2_ref, wsp_ref, out_ref):
    # x_ref  : (1, C, HW)  one batch element, HW on the lane axis
    # w1_ref : (Cr, C)     Linear1 weight (PyTorch (out, in) convention)
    # b1_ref : (Cr, 1)
    # w2_ref : (C, Cr)     Linear2 weight
    # b2_ref : (C, 1)
    # wsp_ref: (1, C)      1x1 conv weight (spatial SE), no bias
    # out_ref: (1, C, HW)
    x = x_ref[0]                                                    # (C, HW) f32

    # ---- channel squeeze: mean over the spatial (lane) axis -> (C, 1) ----
    chn = jnp.mean(x, axis=1, keepdims=True)

    # ---- channel excitation: Linear -> ReLU -> Linear -> sigmoid ----
    h = jnp.dot(w1_ref[...], chn, preferred_element_type=jnp.float32) + b1_ref[...]
    h = jnp.maximum(h, 0.0)                                         # (Cr, 1)
    g = jnp.dot(w2_ref[...], h, preferred_element_type=jnp.float32) + b2_ref[...]
    chn_gate = jax.nn.sigmoid(g)                                    # (C, 1)

    # ---- spatial SE: 1x1 conv as (1, C) @ (C, HW) -> lane-dense (1, HW) ----
    # (MXU M=1 is wasteful but fully hidden under the HBM DMA; avoids a full
    #  (C, HW) VPU temporary that a broadcast-mul + sublane-reduce would need.)
    spa = jnp.dot(wsp_ref[...], x, preferred_element_type=jnp.float32)
    spa_gate = jax.nn.sigmoid(spa)                                  # (1, HW)

    # ---- fused combine: x*cg + x*sg == x*(cg + sg) (2 VPU ops/elem) ----
    out_ref[0] = x * (chn_gate + spa_gate)


def _scse_apply_kernel(x_ref, gate_ref, wsp_ref, out_ref):
    # Tiled elementwise pass (channel gate precomputed in the wrapper).
    # Each HW lane is independent, so a ragged (masked) last tile is safe.
    # x_ref   : (1, C, THW)
    # gate_ref: (1, C, 1)   per-batch channel gate
    # wsp_ref : (1, C)
    x = x_ref[0]                                                    # (C, THW)
    cg = gate_ref[0]                                                # (C, 1)
    spa = jnp.dot(wsp_ref[...], x, preferred_element_type=jnp.float32)  # (1, THW)
    out_ref[0] = x * (cg + jax.nn.sigmoid(spa))


# --------------------------------------------------------------------------
# Wrapper
# --------------------------------------------------------------------------
def scse_block(x_nchw, w1, b1, w2, b2, w_sp, *, vmem_budget_bytes=None):
    """x_nchw: (B, C, H, W) float32.  Weights in PyTorch layout. Returns NCHW."""
    B, C, H, W = x_nchw.shape
    HW = H * W
    Cr = w1.shape[0]

    vmem_cap = _vmem_capacity_bytes()
    if vmem_budget_bytes is None:
        # Generation-aware budget: ~102 MiB on v5e/v6e (128 MiB physical VMEM),
        # ~48 MiB on v7x (64 MiB physical VMEM).
        vmem_budget_bytes = vmem_cap - max(16 << 20, vmem_cap // 5)
    vmem_budget_bytes = int(vmem_budget_bytes)

    # Pure reshape (no HBM transpose): NCHW -> (B, C, HW), HW is the lane axis.
    x = x_nchw.reshape(B, C, HW)
    wsp_row = w_sp.reshape(1, C)

    weight_bytes = 4 * (Cr * C + Cr + C * Cr + C + C)
    blk_bytes = 4 * C * HW                            # one (C, HW) f32 block
    # Fused-path footprint: double-buffered in + out blocks, double-buffered
    # weights/biases, plus ~2 MiB Mosaic internal scratch.
    fused_need = 4 * blk_bytes + 2 * weight_bytes + (2 << 20)

    # v7x-like chips (64 MiB VMEM/core, 2 TensorCores): with B == 1 the fused
    # path's grid=(B,) leaves one core (and its HBM path) idle.  Prefer the
    # tiled path there -- even paying its extra read of x it uses both cores.
    prefer_tiled = (vmem_cap <= (64 << 20)) and (B == 1) and (HW >= 256)

    if fused_need <= vmem_budget_bytes and not prefer_tiled:
        # ---------------- fused single-pass path (1R + 1W of x) ----------------
        b1c = b1.reshape(Cr, 1)
        b2c = b2.reshape(C, 1)
        vmem_limit = int(min(max(fused_need + (4 << 20), 32 << 20),
                             vmem_cap - (4 << 20)))
        out = pl.pallas_call(
            _scse_fused_kernel,
            out_shape=jax.ShapeDtypeStruct((B, C, HW), jnp.float32),
            grid_spec=pltpu.PrefetchScalarGridSpec(
                num_scalar_prefetch=0,
                grid=(B,),
                in_specs=[
                    pl.BlockSpec((1, C, HW), lambda b: (b, 0, 0)),
                    pl.BlockSpec((Cr, C), lambda b: (0, 0)),
                    pl.BlockSpec((Cr, 1), lambda b: (0, 0)),
                    pl.BlockSpec((C, Cr), lambda b: (0, 0)),
                    pl.BlockSpec((C, 1), lambda b: (0, 0)),
                    pl.BlockSpec((1, C), lambda b: (0, 0)),
                ],
                out_specs=pl.BlockSpec((1, C, HW), lambda b: (b, 0, 0)),
            ),
            compiler_params=pltpu.CompilerParams(
                dimension_semantics=("parallel",),
                vmem_limit_bytes=vmem_limit),
        )(x, w1, b1c, w2, b2c, wsp_row)
        return out.reshape(B, C, H, W)

    # ---------------- tiled path (large H*W, or B==1 on v7x) ----------------
    # The channel gate is O(B*C) work: compute it in the wrapper so the big
    # elementwise pass can be tiled / pipelined over HW.
    chn = jnp.mean(x, axis=2)                                    # (B, C)
    h = jnp.maximum(chn @ w1.T + b1, 0.0)                        # (B, Cr)
    chn_gate = jax.nn.sigmoid(h @ w2.T + b2).reshape(B, C, 1)    # (B, C, 1)

    thw = _pick_hw_tile(HW, C, vmem_budget_bytes,
                        min_tiles=2 if prefer_tiled else 1)
    n_t = int(pl.cdiv(HW, thw))                       # ragged last tile is masked
    tiled_need = 4 * (4 * C * thw) + 2 * weight_bytes + (2 << 20)
    vmem_limit = int(min(max(tiled_need + (4 << 20), 32 << 20),
                         vmem_cap - (4 << 20)))

    out = pl.pallas_call(
        _scse_apply_kernel,
        out_shape=jax.ShapeDtypeStruct((B, C, HW), jnp.float32),
        grid_spec=pltpu.PrefetchScalarGridSpec(
            num_scalar_prefetch=0,
            grid=(B, n_t),
            in_specs=[
                pl.BlockSpec((1, C, thw), lambda b, t: (b, 0, t)),
                pl.BlockSpec((1, C, 1), lambda b, t: (b, 0, 0)),
                pl.BlockSpec((1, C), lambda b, t: (0, 0)),
            ],
            out_specs=pl.BlockSpec((1, C, thw), lambda b, t: (b, 0, t)),
        ),
        compiler_params=pltpu.CompilerParams(
            dimension_semantics=("parallel", "parallel"),
            vmem_limit_bytes=vmem_limit),
    )(x, chn_gate, wsp_row)
    return out.reshape(B, C, H, W)


# --------------------------------------------------------------------------
# Params + pure-JAX reference
# --------------------------------------------------------------------------
def init_params(key, channel, reduction=16):
    """Deterministic synthetic parameters matching SCSEBlock.__init__ (PyTorch layouts)."""
    cr = int(channel // reduction)
    k1, k2, k3, k4, k5 = jax.random.split(key, 5)
    w1 = jax.random.normal(k1, (cr, channel), jnp.float32) * 0.1      # Linear1 (out, in)
    b1 = jax.random.normal(k2, (cr,), jnp.float32) * 0.1
    w2 = jax.random.normal(k3, (channel, cr), jnp.float32) * 0.1      # Linear2 (out, in)
    b2 = jax.random.normal(k4, (channel,), jnp.float32) * 0.1
    w_sp = jax.random.normal(k5, (1, channel, 1, 1), jnp.float32) * 0.1  # Conv2d(C,1,1), no bias
    return w1, b1, w2, b2, w_sp


def scse_reference(x, w1, b1, w2, b2, w_sp):
    """Pure-JAX reference mirroring the PyTorch forward (NCHW)."""
    B, C, H, W = x.shape
    chn = jnp.mean(x, axis=(2, 3))                                # (B, C)
    h = jnp.maximum(chn @ w1.T + b1, 0.0)
    gate = jax.nn.sigmoid(h @ w2.T + b2)[:, :, None, None]        # (B, C, 1, 1)
    chn_se = x * gate
    spa = jnp.einsum("bchw,c->bhw", x, w_sp.reshape(C))[:, None]  # (B, 1, H, W)
    spa_se = x * jax.nn.sigmoid(spa)
    return chn_se + spa_se


if __name__ == "__main__":
    key = jax.random.PRNGKey(0)
    kx, kx2, kp = jax.random.split(key, 3)

    B, C, H, W = 2, 32, 16, 16   # channel=32, reduction=16 -> hidden=2
    x = jax.random.normal(kx, (B, C, H, W), jnp.float32)
    w1, b1, w2, b2, w_sp = init_params(kp, C, reduction=16)
    ref = scse_reference(x, w1, b1, w2, b2, w_sp)

    # 1) Fused single-pass path (generation-aware default VMEM budget).
    out = jax.block_until_ready(scse_block(x, w1, b1, w2, b2, w_sp))
    assert out.shape == (B, C, H, W)
    assert jnp.allclose(out, ref, atol=1e-5, rtol=1e-5), "fused path mismatch vs reference"

    # 2) Tiled path, exact tiling (HW=256 -> 2 tiles of 128), forced via small budget.
    out_t = jax.block_until_ready(
        scse_block(x, w1, b1, w2, b2, w_sp, vmem_budget_bytes=100_000))
    assert jnp.allclose(out_t, ref, atol=1e-5, rtol=1e-5), "tiled path mismatch vs reference"

    # 3) Non-multiple-of-128 spatial size (14x14 = 196 lanes), both paths:
    #    fused full-HW block, and tiled path with a ragged (masked) last tile.
    x2 = jax.random.normal(kx2, (1, C, 14, 14), jnp.float32)
    ref2 = scse_reference(x2, w1, b1, w2, b2, w_sp)
    out2_f = jax.block_until_ready(scse_block(x2, w1, b1, w2, b2, w_sp))
    assert jnp.allclose(out2_f, ref2, atol=1e-5, rtol=1e-5), "fused ragged-HW mismatch"
    out2_t = jax.block_until_ready(
        scse_block(x2, w1, b1, w2, b2, w_sp, vmem_budget_bytes=100_000))
    assert jnp.allclose(out2_t, ref2, atol=1e-5, rtol=1e-5), "tiled ragged-tile mismatch"

    print("KERNEL_OK")
</pallas_src>

<mosaic_0001>
module attributes {stable_mosaic.version = 11 : i64} {
  func.func @_scse_fused_kernel(%arg0: i32, %arg1: memref<1x32x256xf32, #tpu.memory_space<vmem>>, %arg2: memref<2x32xf32, #tpu.memory_space<vmem>>, %arg3: memref<2x1xf32, #tpu.memory_space<vmem>>, %arg4: memref<32x2xf32, #tpu.memory_space<vmem>>, %arg5: memref<32x1xf32, #tpu.memory_space<vmem>>, %arg6: memref<1x32xf32, #tpu.memory_space<vmem>>, %arg7: memref<1x32x256xf32, #tpu.memory_space<vmem>>) attributes {dimension_semantics = [#tpu.dimension_semantics<parallel>], iteration_bounds = array<i64: 2>, scalar_prefetch = 0 : i64, scratch_operands = 0 : i64, tpu.core_type = #tpu.core_type<tc>, window_params = [{transform_indices = @transform_0, window_bounds = array<i64: 1, 32, 256>}, {pipeline_mode = #tpu.pipeline_mode<synchronous>, transform_indices = @transform_1, window_bounds = array<i64: 2, 32>}, {pipeline_mode = #tpu.pipeline_mode<synchronous>, transform_indices = @transform_2, window_bounds = array<i64: 2, 1>}, {pipeline_mode = #tpu.pipeline_mode<synchronous>, transform_indices = @transform_3, window_bounds = array<i64: 32, 2>}, {pipeline_mode = #tpu.pipeline_mode<synchronous>, transform_indices = @transform_4, window_bounds = array<i64: 32, 1>}, {pipeline_mode = #tpu.pipeline_mode<synchronous>, transform_indices = @transform_5, window_bounds = array<i64: 1, 32>}, {transform_indices = @transform_6, window_bounds = array<i64: 1, 32, 256>}]} {
    %c0 = arith.constant 0 : index
    %c0_0 = arith.constant 0 : index
    %c0_1 = arith.constant 0 : index
    %0 = vector.load %arg1[%c0, %c0_0, %c0_1] : memref<1x32x256xf32, #tpu.memory_space<vmem>>, vector<1x32x256xf32>
    %1 = vector.shape_cast %0 : vector<1x32x256xf32> to vector<32x256xf32>
    %cst = arith.constant dense<0.000000e+00> : vector<32xf32>
    %2 = vector.multi_reduction <add>, %1, %cst [1] : vector<32x256xf32> to vector<32xf32>
    %3 = vector.shape_cast %2 : vector<32xf32> to vector<32x1xf32>
    %cst_2 = arith.constant 2.560000e+02 : f32
    %4 = vector.broadcast %cst_2 : f32 to vector<32x1xf32>
    %5 = arith.divf %3, %4 : vector<32x1xf32>
    %c0_3 = arith.constant 0 : index
    %c0_4 = arith.constant 0 : index
    %6 = vector.load %arg2[%c0_3, %c0_4] : memref<2x32xf32, #tpu.memory_space<vmem>>, vector<2x32xf32>
    %cst_5 = arith.constant dense<0.000000e+00> : vector<2x1xf32>
    %7 = tpu.matmul %6, %5, %cst_5 {dimension_numbers = #tpu.dot_dimension_numbers<[1], [0], [0], [1], [0, 0, 1, 1], [], []>} : vector<2x32xf32>, vector<32x1xf32>, vector<2x1xf32> -> vector<2x1xf32>
    %c0_6 = arith.constant 0 : index
    %c0_7 = arith.constant 0 : index
    %8 = vector.load %arg3[%c0_6, %c0_7] : memref<2x1xf32, #tpu.memory_space<vmem>>, vector<2x1xf32>
    %9 = arith.addf %7, %8 : vector<2x1xf32>
    %cst_8 = arith.constant 0.000000e+00 : f32
    %10 = vector.broadcast %cst_8 : f32 to vector<2x1xf32>
    %11 = arith.maximumf %9, %10 : vector<2x1xf32>
    %c0_9 = arith.constant 0 : index
    %c0_10 = arith.constant 0 : index
    %12 = vector.load %arg4[%c0_9, %c0_10] : memref<32x2xf32, #tpu.memory_space<vmem>>, vector<32x2xf32>
    %cst_11 = arith.constant dense<0.000000e+00> : vector<32x1xf32>
    %13 = tpu.matmul %12, %11, %cst_11 {dimension_numbers = #tpu.dot_dimension_numbers<[1], [0], [0], [1], [0, 0, 1, 1], [], []>} : vector<32x2xf32>, vector<2x1xf32>, vector<32x1xf32> -> vector<32x1xf32>
    %c0_12 = arith.constant 0 : index
    %c0_13 = arith.constant 0 : index
    %14 = vector.load %arg5[%c0_12, %c0_13] : memref<32x1xf32, #tpu.memory_space<vmem>>, vector<32x1xf32>
    %15 = arith.addf %13, %14 : vector<32x1xf32>
    %16 = arith.negf %15 : vector<32x1xf32>
    %17 = math.exp %16 : vector<32x1xf32>
    %cst_14 = arith.constant 1.000000e+00 : f32
    %18 = vector.broadcast %cst_14 : f32 to vector<32x1xf32>
    %19 = arith.addf %18, %17 : vector<32x1xf32>
    %20 = arith.divf %18, %19 : vector<32x1xf32>
    %c0_15 = arith.constant 0 : index
    %c0_16 = arith.constant 0 : index
    %21 = vector.load %arg6[%c0_15, %c0_16] : memref<1x32xf32, #tpu.memory_space<vmem>>, vector<1x32xf32>
    %cst_17 = arith.constant dense<0.000000e+00> : vector<1x256xf32>
    %22 = tpu.matmul %21, %1, %cst_17 {dimension_numbers = #tpu.dot_dimension_numbers<[1], [0], [0], [1], [0, 0, 1, 1], [], []>} : vector<1x32xf32>, vector<32x256xf32>, vector<1x256xf32> -> vector<1x256xf32>
    %23 = arith.negf %22 : vector<1x256xf32>
    %24 = math.exp %23 : vector<1x256xf32>
    %cst_18 = arith.constant 1.000000e+00 : f32
    %25 = vector.broadcast %cst_18 : f32 to vector<1x256xf32>
    %26 = arith.addf %25, %24 : vector<1x256xf32>
    %27 = arith.divf %25, %26 : vector<1x256xf32>
    %28 = vector.broadcast %20 : vector<32x1xf32> to vector<32x256xf32>
    %29 = vector.broadcast %27 : vector<1x256xf32> to vector<32x256xf32>
    %30 = arith.addf %28, %29 : vector<32x256xf32>
    %31 = arith.mulf %1, %30 : vector<32x256xf32>
    %c0_19 = arith.constant 0 : index
    %c0_20 = arith.constant 0 : index
    %c0_21 = arith.constant 0 : index
    %32 = vector.load %arg7[%c0_19, %c0_20, %c0_21] : memref<1x32x256xf32, #tpu.memory_space<vmem>>, vector<1x32x256xf32>
    %33 = vector.shape_cast %32 : vector<1x32x256xf32> to vector<32x256xf32>
    %34 = vector.shape_cast %31 : vector<32x256xf32> to vector<1x32x256xf32>
    tpu.vector_store %arg7[%c0_19, %c0_20, %c0_21], %34 {strides = array<i32>} : memref<1x32x256xf32, #tpu.memory_space<vmem>>, vector<1x32x256xf32>,
    return
  }
  func.func @transform_0(%arg0: i32) -> (i32, i32, i32) {
    %c0_i32 = arith.constant 0 : i32
    %c0_i32_0 = arith.constant 0 : i32
    %c0_i32_1 = arith.constant 0 : i32
    return %arg0, %c0_i32, %c0_i32_0 : i32, i32, i32
  }
  func.func @transform_1(%arg0: i32) -> (i32, i32) {
    %c0_i32 = arith.constant 0 : i32
    %c0_i32_0 = arith.constant 0 : i32
    %c0_i32_1 = arith.constant 0 : i32
    return %c0_i32, %c0_i32_0 : i32, i32
  }
  func.func @transform_2(%arg0: i32) -> (i32, i32) {
    %c0_i32 = arith.constant 0 : i32
    %c0_i32_0 = arith.constant 0 : i32
    %c0_i32_1 = arith.constant 0 : i32
    return %c0_i32, %c0_i32_0 : i32, i32
  }
  func.func @transform_3(%arg0: i32) -> (i32, i32) {
    %c0_i32 = arith.constant 0 : i32
    %c0_i32_0 = arith.constant 0 : i32
    %c0_i32_1 = arith.constant 0 : i32
    return %c0_i32, %c0_i32_0 : i32, i32
  }
  func.func @transform_4(%arg0: i32) -> (i32, i32) {
    %c0_i32 = arith.constant 0 : i32
    %c0_i32_0 = arith.constant 0 : i32
    %c0_i32_1 = arith.constant 0 : i32
    return %c0_i32, %c0_i32_0 : i32, i32
  }
  func.func @transform_5(%arg0: i32) -> (i32, i32) {
    %c0_i32 = arith.constant 0 : i32
    %c0_i32_0 = arith.constant 0 : i32
    %c0_i32_1 = arith.constant 0 : i32
    return %c0_i32, %c0_i32_0 : i32, i32
  }
  func.func @transform_6(%arg0: i32) -> (i32, i32, i32) {
    %c0_i32 = arith.constant 0 : i32
    %c0_i32_0 = arith.constant 0 : i32
    %c0_i32_1 = arith.constant 0 : i32
    return %arg0, %c0_i32, %c0_i32_0 : i32, i32, i32
  }
}

</mosaic_0001>

<bundles_post_ra>
// kernel: tpu_custom_call.1
= control target key start
LH: loop header
LB: loop body
LE: loop exit
PB: predicated region body
PF: predicated region fallthrough
CT: control target
= control target key end

     0   :  { %11 = vsyncpa [#allocation3], 0  ;;  %s1244_s0 = inlined_call_operand.hbm [shape: f32[2,32,256], index: 0, kind: input, shape index: {}]   ;;  %s1245_s1 = inlined_call_operand.vmem [shape: f32[2,32], index: 1, kind: input, shape index: {}]   ;;  %s1246_s2 = inlined_call_operand.vmem [shape: f32[2,1], index: 2, kind: input, shape index: {}]   ;;  %s1247_s3 = inlined_call_operand.vmem [shape: f32[32,2], index: 3, kind: input, shape index: {}]   ;;  %s1248_s4 = inlined_call_operand.vmem [shape: f32[32,1], index: 4, kind: input, shape index: {}]   ;;  %s1249_s5 = inlined_call_operand.vmem [shape: f32[1,32], index: 5, kind: input, shape index: {}]   ;;  %s1250_s6 = inlined_call_operand.hbm [shape: f32[2,32,256], index: 6, kind: output, shape index: {}]  }
   0x1   :  { %13 = vsyncpa [#allocation3 + $0x1], 0 }
   0x2   :  { %14 = vsyncpa [#allocation4], 0 }
   0x3   :  { %16 = vsyncpa [#allocation4 + $0x1], 0  ;;  %s1007_s21 = smov 0   ;;  %s1009_s22 = smov 0  }
   0x4   :  { %s1011_s23 = smov 0   ;;  %s1013_s24 = smov 0  }
   0x5 LB: > { %s1028_s25 = sadd.s32 4294967295, %s961_s24   ;;  %s732_s26 = sadd.s32 4294967294, %s961_s24   ;;  %s961_s24 = sphi %s1013_s24, %s1265_s24   ;;  %s957_s23 = sphi %s1011_s23, %s1264_s23   ;;  %s953_s22 = sphi %s1009_s22, %s1263_s22   ;;  %s949_s21 = sphi %s1007_s21, %s1262_s21  }
   0x6   : > { %s1032_s27 = sadd.s32 1, %s961_s24   ;;  %s29_s28 = sadd.s32 1, %s957_s23 }
   0x7   : > { %s26_s29 = ssub.s32 %s961_s24, %s1032_s27  ;;  %p36_p0 = scmp.ne.s32.totalorder %s957_s23, %s953_s22 }
   0x8   : > { %p27_p1 = scmp.eq.s32.totalorder %s26_s29, 0  ;;  %p37_p2 = scmp.eq.s32.totalorder %s961_s24, 0 }
   0x9   : > { %p42_p3 = scmp.ne.s32.totalorder %s953_s22, %s949_s21  ;;  %p43_p4 = scmp.eq.s32.totalorder %s1028_s25, 0 }
   0xa   : > { %s1044_s30 = scalar_select %p27_p1, %s957_s23, %s29_s28  }
   0xb   : > { %p1046_p5 = por %p37_p2, %p36_p0  ;;  %p1050_p6 = por %p43_p4, %p42_p3 }
   0xc   : > { %p171_p7 = scmp.eq.s32.totalorder %s1028_s25, 1  ;;  %p177_p8 = scmp.eq.s32.totalorder %s732_s26, 1 }
   0xd   : > { %s1254_s8 = scalar_select %p1050_p6, 1, 0 }
   0xe   : > { %p802_p10 = scmp.lt.s32.totalorder %s961_s24, 2  ;;  %p1057_p11 = por %p171_p7, %p36_p0 }
   0xf   : > { %p1061_p12 = por %p177_p8, %p42_p3  ;;  %s212_s11 = sand.u32 1, %s957_s23  }
  0x10   : > { %s1255_s9 = scalar_select %p1057_p11, 1, 0 }
  0x11   : > { %s1256_s10 = scalar_select %p1061_p12, 1, 0 }
  0x12   : > { %s759_s12 = sshll.u32 %s961_s24, 10  ;;  %s735_s13 = sshll.u32 %s212_s11, 6 }
  0x13   : > { %s1070_s16 = scalar_lea.hbm %s1244_s0, %s759_s12  ;;  %s216_s17 = scalar_lea.vmem [#allocation2], %s735_s13 }
  0x14   : > { %s223_s18 = sshll.u32 %s216_s17, 4  ;;  %p1074_p13 = pnand %p802_p10, %p1046_p5  ;;  %s1078_s18 = int_to_ptr.vmem [resolvable:$true] %s223_s18 }
  0x15   : > { %s1080_s20 = scalar_lea.sflag [#allocation3], %s212_s11  ;;  %s869_s26 = scalar_lea.hbm %s1070_s16, 1024 }
  0x16   : > { %p870_p0 = scmp.ne.s32.totalorder %s1070_s16, %s869_s26  ;;  %p871_p1 = pneg %p1074_p13 }
  0x17   : > { %s874_s12 = scalar_lea.hbm %s1244_s0, 2048  ;;  %p875_p4 = scmp.lt.s32.totalorder %s1070_s16, %s1244_s0 }
  0x18   : > { %p872_p2 = pnand %p871_p1, %p870_p0  ;;  %p876_p5 = scmp.lt.s32.totalorder %s874_s12, %s869_s26 }
  0x1a   : > { %p873_p3 = pneg %p872_p2  ;;  %p877_p7 = por %p876_p5, %p875_p4 }
  0x1c   : > { %p878_p8 = pnand %p877_p7, %p873_p3 }
  0x1e   : > { %881 = shalt.err (!%p878_p8)
}
  0x1f   : > { %s882_s11 = scalar_lea.vmem %s1078_s18, 1024  ;;  %s963_s14 = smov [#allocation2]  }
  0x20   : > { %p883_p10 = scmp.ne.s32.totalorder %s1078_s18, %s882_s11  ;;  %s887_s15 = sshll.u32 %s963_s14, 4  ;;  %s888_s15 = int_to_ptr.vmem [resolvable:$false] %s887_s15 }
  0x21   : > { %s889_s17 = scalar_lea.vmem %s888_s15, 2048  ;;  %p890_p2 = scmp.lt.s32.totalorder %s1078_s18, %s888_s15 }
  0x22   : > { %p885_p9 = pnand %p883_p10, %p871_p1  ;;  %p891_p12 = scmp.lt.s32.totalorder %s889_s17, %s882_s11 }
  0x24   : > { %p886_p0 = pneg %p885_p9  ;;  %p892_p11 = por %p891_p12, %p890_p2 }
  0x26   : > { %p893_p6 = pnand %p892_p11, %p886_p0 }
  0x28   : > { %896 = shalt.err (!%p893_p6)
}
  0x29   : > { %s964_s26 = smov 256   ;;  %s965_s28 = smov 16  }
  0x2a   : > { %797 = dma.hbm_to_vmem [thread:$0]  (!%p1074_p13), %s1070_s16, 1024, %s1078_s18, %s1080_s20, %s964_s26, %s964_s26, %s965_s28  }
  0x2b   : > { %p738_p9 = scmp.ge.s32.totalorder %s961_s24, 1  ;;  %p231_p1 = scmp.lt.s32.totalorder %s961_s24, 3 }
  0x2d   : > { %p232_p3 = pnand %p738_p9, %p231_p1 }
  0x2e   : > { %s1104_s29 = sand.u32 (!%p232_p3), 1, %s953_s22   ;;  %p1258_p6 = scmp.ne.s32.totalorder (!%p232_p3), %s1254_s8, 0 }
  0x2f   : > { %235 = sbr.rel (%p232_p3) target bundleno = 783 (0x30f), region = 44  ;;  %s739_s12 = sshll.u32 (!%p232_p3), %s1104_s29, 6 }
  0x30   : > { %s238_s7 = scalar_lea.sflag (!%p232_p3), [#allocation3], %s1104_s29  ;;  %s241_s13 = scalar_lea.vmem (!%p232_p3), [#allocation2], %s739_s12 }
  0x34   : > { %940 = dma.done.wait (%p1258_p6), %s238_s7, 1024  }
  0x35   : > { %942 = vsyncadd (%p1258_p6), %s238_s7, 4294966272  ;;  %v1114_v0 = vld [vmem:[%s241_s13 + $0x30] sm:$0xff]  ;;  %v1116_v1 = vld [vmem:[%s241_s13 + $0x38] sm:$0xff]  ;;  %v966_v12 = vmov 0.0   ;;  %vm967_vm0 = vmmov 0   ;;  %vm297_vm1 = vcmask 261120  }
  0x36   : > { %v1118_v2 = vld [vmem:[%s241_s13 + $0x20] sm:$0xff]  ;;  %v287_v3 = vadd.f32 %v1116_v1, %v1114_v0  ;;  %v1122_v4 = vld [vmem:[%s241_s13 + $0x28] sm:$0xff]  ;;  %v1124_v5 = vld [vmem:[%s241_s13 + $0x10] sm:$0xff]  ;;  %771 = vmatprep.subr.mxu0 %v966_v12  ;;  %779 = vmatprep.mubr.msk.f32.mxu0 %vm967_vm0, %v966_v12  ;;  %vm380_vm2 = vcmask 15360   ;;  %vm393_vm3 = vcmask 1041408   ;;  %v968_v32 = vmov 0  }
  0x37   : > { %v1126_v6 = vld [vmem:[%s241_s13 + $0x18] sm:$0xff]  ;;  %v1130_v8 = vld [vmem:[%s241_s13] sm:$0xff]  ;;  %v1132_v9 = vld [vmem:[%s241_s13 + $0x8] sm:$0xff]  ;;  %v284_v10 = vadd.f32 %v1122_v4, %v1118_v2  ;;  %844 = vset.pattern.permute.xlu1 %v968_v32  ;;  %843 = vset.pattern.permute.xlu0 %v968_v32  ;;  %s269_s26 = scalar_lea.vmem [#allocation5], %s739_s12  ;;  %s760_s28 = sshll.u32 %s1028_s25, 10 }
  0x38   : > { %v281_v7 = vadd.f32 %v1126_v6, %v1124_v5  ;;  %288 = vadd.xlane.f32.xlu0 %v287_v3  ;;  %v278_v11 = vadd.f32 %v1132_v9, %v1130_v8  ;;  %v295_v21 = vld [vmem:[%s1245_s1] sm:$0x3]  ;;  %v373_v28 = vld [vmem:[%s1247_s3 + $0x8] sm:$0xff]  ;;  %v374_v29 = vld [vmem:[%s1247_s3 + $0x10] sm:$0xff]  ;;  %s659_s7 = sshll.u32 %s269_s26, 4  ;;  %s1197_s8 = scalar_lea.hbm %s1250_s6, %s760_s28  ;;  %s1199_s7 = int_to_ptr.vmem [resolvable:$true] %s659_s7 }
  0x39   : > { %v372_v22 = vld [vmem:[%s1247_s3] sm:$0xff]  ;;  %v375_v30 = vld [vmem:[%s1247_s3 + $0x18] sm:$0xff]  ;;  %v377_v33 = vld [vmem:[%s1248_s4 + $0x8] sm:$0xff]  ;;  %s646_s25 = scalar_lea.sflag [#allocation4], %s1104_s29  ;;  %s897_s16 = scalar_lea.vmem %s1199_s7, 1024 }
  0x3a   : > { %282 = vadd.xlane.f32.xlu1 %v281_v7  ;;  %784 = vmatprep.mubr.msk.f32.mxu1 %vm380_vm2, %v372_v22  ;;  %v296_v23 = vld [vmem:[%s1246_s2] sm:$0x3]  ;;  %v379_v38 = vld [vmem:[%s1248_s4 + $0x18] sm:$0xff]  ;;  %v378_v42 = vld [vmem:[%s1248_s4 + $0x10] sm:$0xff]  ;;  %p898_p11 = scmp.ne.s32.totalorder %s1199_s7, %s897_s16  ;;  %p1259_p12 = scmp.ne.s32.totalorder %s1255_s9, 0 }
  0x3b   : > { %v506_v31 = vld [vmem:[%s1249_s5] sm:$0x1]  ;;  %s969_s18 = smov [#allocation5]  }
  0x3c   : > { %285 = vadd.xlane.f32.xlu0 %v284_v10  ;;  %v376_v35 = vld [vmem:[%s1248_s4] sm:$0xff]  ;;  %p899_p13 = pnand %p898_p11, %p1259_p12  ;;  %s901_s19 = sshll.u32 %s969_s18, 4  ;;  %s902_s19 = int_to_ptr.vmem [resolvable:$false] %s901_s19 }
  0x3d   : > { %s903_s20 = scalar_lea.vmem %s902_s19, 2048  ;;  %p904_p5 = scmp.lt.s32.totalorder %s1199_s7, %s902_s19 }
  0x3e   : > { %279 = vadd.xlane.f32.xlu1 %v278_v11  ;;  %p900_p4 = pneg %p899_p13  ;;  %p905_p7 = scmp.lt.s32.totalorder %s903_s20, %s897_s16 }
  0x40   : > { %p906_p8 = por %p905_p7, %p904_p5 }
  0x42   : > { %p907_p10 = pnand %p906_p8, %p900_p4 }
  0xc1   : > { %v289_v13 = vpop.xlane.xlu0 %288 }
  0xc2   : > { %v294_v14 = vmul.f32 0.00390625, %v289_v13  ;;  %v613_v13 = vlaneseq }
  0xc3   : > { %v283_v15 = vpop.xlane.xlu1 %282 }
  0xc4   : > { %772 = vmatpush3.msra.mxu0 %v294_v14  ;;  %v292_v19 = vmul.f32 0.00390625, %v283_v15  ;;  %v614_v14 = vshrl.u32 %v613_v13, 7 }
  0xc5   : > { %v286_v16 = vpop.xlane.xlu0 %285  ;;  %773 = vmatprep.subr.mxu0 %v966_v12 }
  0xc6   : > { %v293_v17 = vmul.f32 0.00390625, %v286_v16  ;;  %v615_v16 = vsub.s32 0, %v614_v14 }
  0xc7   : > { %v280_v18 = vpop.xlane.xlu1 %279 }
  0xc8   : > { %774 = vmatpush3.msra.mxu0 %v293_v17  ;;  %v291_v20 = vmul.f32 0.00390625, %v280_v18 }
  0xc9   : > { %775 = vmatprep.subr.mxu0 %v966_v12 }
  0xca   : > { %776 = vmatpush3.msra.mxu0 %v292_v19 }
  0xcb   : > { %777 = vmatprep.subr.mxu0 %v966_v12 }
  0xcc   : > { %778 = vmatpush3.msra.mxu0 %v291_v20 }
  0xcd   : > { %780 = vmatmul.mubr.msk.f32.vlgmr.msra.gmra.mxu0 %vm297_vm1, %v295_v21 }
 0x18d   : > { %v367_v24 = vpop.f32.mrf.mxu0 }
 0x18e   : > { %v368_v25 = vadd.f32 %v367_v24, %v296_v23 }
 0x18f   : > { %v781_v26 = vpop.f32.mrf.mxu0 }
 0x190   : > { %v371_v27 = vmax.f32 %v368_v25, 0.0 }
 0x192   : > { %782 = vmatprep.subr.msk.mxu1 %vm393_vm3, %v371_v27 }
 0x193   : > { %783 = vmatpush3.msk.msra.mxu1 %vm393_vm3, %v371_v27 }
 0x194   : > { %785 = vmatmul.mubr.msk.f32.vlgmr.msra.gmra.mxu1 %vm380_vm2, %v373_v28  ;;  %534 = vmatprep.subr.mxu1 %v1116_v1 }
 0x195   : > { %787 = vmatprep.mubr.msk.f32.mxu1 %vm380_vm2, %v374_v29  ;;  %535 = vmatpush1.msra.mxu1 %v1114_v0 }
 0x196   : > { %536 = vmatprep.subr.mxu1 %v1122_v4 }
 0x197   : > { %537 = vmatpush1.msra.mxu1 %v1118_v2 }
 0x198   : > { %788 = vmatmul.mubr.msk.f32.gmra.mxu1 %vm380_vm2, %v375_v30  ;;  %538 = vmatprep.subr.mxu1 %v1126_v6 }
 0x199   : > { %539 = vmatpush1.msra.mxu1 %v1124_v5  ;;  %574 = vmatprep.mubr.f32.mxu1 %v966_v12 }
 0x19a   : > { %540 = vmatprep.subr.mxu1 %v1132_v9 }
 0x19b   : > { %541 = vmatpush1.msra.mxu1 %v1130_v8 }
 0x19c   : > { %751 = vmatmul.mubr.msk.f32.vlgmr.msra.gmra.mxu1 %vm297_vm1, %v506_v31 }
 0x254   : > { %v786_v34 = vpop.f32.mrf.mxu1 }
 0x255   : > { %v469_v36 = vadd.f32 %v786_v34, %v377_v33 }
 0x256   : > { %v463_v37 = vpop.f32.mrf.mxu1 }
 0x257   : > { %v748_v39 = vmul.f32 -1.442695, %v469_v36  ;;  %v464_v40 = vadd.f32 %v463_v37, %v376_v35 }
 0x258   : > { %v789_v41 = vpop.f32.mrf.mxu1 }
 0x259   : > { %845 = vpow2.f32 %v748_v39  ;;  %v747_v43 = vmul.f32 -1.442695, %v464_v40  ;;  %v479_v44 = vadd.f32 %v789_v41, %v379_v38 }
 0x25a   : > { %v473_v45 = vpop.f32.mrf.mxu1 }
 0x25b   : > { %847 = vpow2.f32 %v747_v43  ;;  %v750_v46 = vmul.f32 -1.442695, %v479_v44  ;;  %v474_v47 = vadd.f32 %v473_v45, %v378_v42 }
 0x25c   : > { %v576_v61 = vpop.f32.mrf.mxu1 }
 0x25d   : > { %v749_v48 = vmul.f32 -1.442695, %v474_v47  ;;  %849 = vpow2.f32 %v750_v46  ;;  %v752_v63 = vmul.f32 -1.442695, %v576_v61 }
 0x25e   : > { %v578_v62 = vpop.f32.mrf.mxu1 }
 0x25f   : > { %851 = vpow2.f32 %v749_v48  ;;  %v753_v3 = vmul.f32 -1.442695, %v578_v62 }
 0x266   : > { %v846_v49 = vpop.eup %845 }
 0x267   : > { %v495_v50 = vadd.f32 1.0, %v846_v49 }
 0x268   : > { %v848_v51 = vpop.eup %847 }
 0x269   : > { %853 = vrcp.f32 %v495_v50  ;;  %v494_v52 = vadd.f32 1.0, %v848_v51 }
 0x26a   : > { %v850_v53 = vpop.eup %849 }
 0x26b   : > { %855 = vrcp.f32 %v494_v52  ;;  %v497_v56 = vadd.f32 1.0, %v850_v53 }
 0x26c   : > { %v852_v54 = vpop.eup %851 }
 0x26d   : > { %v496_v55 = vadd.f32 1.0, %v852_v54 }
 0x26f   : > { %857 = vrcp.f32 %v496_v55 }
 0x270   : > { %859 = vrcp.f32 %v497_v56 }
 0x271   : > { %861 = vpow2.f32 %v752_v63 }
 0x272   : > { %863 = vpow2.f32 %v753_v3 }
 0x276   : > { %v854_v57 = vpop.eup %853 }
 0x277   : > { %600 = vperm.xlu1 %844, %v854_v57  }
 0x278   : > { %v856_v58 = vpop.eup %855 }
 0x279   : > { %595 = vperm.xlu0 %843, %v856_v58  }
 0x27c   : > { %v858_v59 = vpop.eup %857 }
 0x27d   : > { %605 = vperm.xlu1 %844, %v858_v59   ;;  %v860_v60 = vpop.eup %859 }
 0x27e   : > { %v862_v7 = vpop.eup %861 }
 0x27f   : > { %v864_v10 = vpop.eup %863  ;;  %v587_v11 = vadd.f32 1.0, %v862_v7 }
 0x280   : > { %v588_v12 = vadd.f32 1.0, %v864_v10 }
 0x281   : > { %610 = vperm.xlu1 %844, %v860_v60   ;;  %865 = vrcp.f32 %v587_v11 }
 0x282   : > { %867 = vrcp.f32 %v588_v12 }
 0x28e   : > { %v866_v15 = vpop.eup %865 }
 0x28f   : > { %v868_v17 = vpop.eup %867  ;;  %v616_v18 = vrot.slane %v866_v15, %v615_v16 }
 0x290   : > { %v620_v19 = vrot.slane %v868_v17, %v615_v16 }
 0x2f2   : > { %v601_v20 = vpop.permute.xlu1 %600 }
 0x2f3   : > { %v623_v21 = vadd.f32 %v616_v18, %v601_v20  ;;  %v624_v22 = vadd.f32 %v620_v19, %v601_v20 }
 0x2f4   : > { %v596_v23 = vpop.permute.xlu0 %595 }
 0x2f5   : > { %v631_v24 = vmul.f32 %v623_v21, %v1124_v5  ;;  %v632_v25 = vmul.f32 %v624_v22, %v1126_v6  ;;  %v621_v26 = vadd.f32 %v616_v18, %v596_v23  ;;  %v622_v27 = vadd.f32 %v620_v19, %v596_v23 }
 0x2f7   : > { %639 = vst [vmem:[%s269_s26 + $0x10] sm:$0xff] %v631_v24  ;;  %640 = vst [vmem:[%s269_s26 + $0x18] sm:$0xff] %v632_v25  ;;  %v629_v28 = vmul.f32 %v621_v26, %v1130_v8  ;;  %v630_v29 = vmul.f32 %v622_v27, %v1132_v9 }
 0x2f8   : > { %v606_v30 = vpop.permute.xlu1 %605 }
 0x2f9   : > { %637 = vst [vmem:[%s269_s26] sm:$0xff] %v629_v28  ;;  %638 = vst [vmem:[%s269_s26 + $0x8] sm:$0xff] %v630_v29  ;;  %v625_v31 = vadd.f32 %v616_v18, %v606_v30  ;;  %v626_v32 = vadd.f32 %v620_v19, %v606_v30 }
 0x2fb   : > { %v633_v5 = vmul.f32 %v625_v31, %v1118_v2  ;;  %v634_v6 = vmul.f32 %v626_v32, %v1122_v4 }
 0x2fc   : > { %v611_v33 = vpop.permute.xlu1 %610 }
 0x2fd   : > { %641 = vst [vmem:[%s269_s26 + $0x20] sm:$0xff] %v633_v5  ;;  %642 = vst [vmem:[%s269_s26 + $0x28] sm:$0xff] %v634_v6  ;;  %v627_v34 = vadd.f32 %v616_v18, %v611_v33  ;;  %v628_v8 = vadd.f32 %v620_v19, %v611_v33 }
 0x2ff   : > { %v635_v2 = vmul.f32 %v627_v34, %v1114_v0  ;;  %v636_v4 = vmul.f32 %v628_v8, %v1116_v1 }
 0x301   : > { %643 = vst [vmem:[%s269_s26 + $0x30] sm:$0xff] %v635_v2  ;;  %644 = vst [vmem:[%s269_s26 + $0x38] sm:$0xff] %v636_v4 }
 0x302   : > { %910 = shalt.err (!%p907_p10)
}
 0x303   : > { %s911_s11 = scalar_lea.hbm %s1197_s8, 1024  ;;  %s915_s17 = scalar_lea.hbm %s1250_s6, 2048 }
 0x304   : > { %p912_p0 = scmp.ne.s32.totalorder %s1197_s8, %s911_s11  ;;  %p916_p1 = scmp.lt.s32.totalorder %s1197_s8, %s1250_s6 }
 0x305   : > { %p917_p3 = scmp.lt.s32.totalorder %s915_s17, %s911_s11 }
 0x306   : > { %p913_p2 = pnand %p912_p0, %p1259_p12 }
 0x307   : > { %p918_p6 = por %p917_p3, %p916_p1 }
 0x308   : > { %p914_p9 = pneg %p913_p2 }
 0x30a   : > { %p919_p11 = pnand %p918_p6, %p914_p9 }
 0x30c   : > { %922 = shalt.err (!%p919_p11)
}
 0x30d   : > { %s970_s12 = smov 256   ;;  %s971_s13 = smov 16  }
 0x30e   : > { %792 = dma.vmem_to_hbm [thread:$0]  (%p1259_p12), %s1199_s7, 1024, %s1197_s8, %s646_s25, %s970_s12, %s970_s12, %s971_s13  }
 0x30f PF: > { %s674_s16 = sand.u32 1, %s949_s21   ;;  %p1260_p13 = scmp.ne.s32.totalorder %s1256_s10, 0 }
 0x310   : > { %p1261_p4 = scmp.ge.s32.totalorder %s961_s24, 2  ;;  %s675_s18 = scalar_lea.sflag [#allocation4], %s674_s16 }
 0x312   : > { %p799_p5 = pnand %p1261_p4, %p1260_p13 }
 0x314   : > { %p800_p7 = pneg %p799_p5 }
 0x316   : > { %944 = dma.done.wait (%p800_p7), %s675_s18, 1024  }
 0x317   : > { %946 = vsyncadd (%p800_p7), %s675_s18, 4294966272  ;;  %p19_p8 = scmp.ge.s32.totalorder %s1032_s27, 4   ;;  %s1262_s21 = smov %s953_s22 }
 0x318   : > { %s1263_s22 = smov %s957_s23  ;;  %s1264_s23 = smov %s1044_s30 }
 0x319   : > { %s1265_s24 = smov %s1032_s27  ;;  %21 = sbr.rel (!%p19_p8) target bundleno = 5 (0x5), region = 89 }
 0x31e   :  { %680 = vsyncpa [#allocation3], 1 }
 0x31f   :  { %682 = vsyncpa [#allocation3 + $0x1], 1 }
 0x320   :  { %683 = vsyncpa [#allocation4], 1 }
 0x321   :  { %685 = vsyncpa [#allocation4 + $0x1], 1 }

</bundles_post_ra>
